<compile_context>
chip_gen: v5e
topology: v5e:2x2
jax: 0.10.0
libtpu: 0.0.40
codegen_flags: <defaults>
</compile_context>

<pallas_src>
import functools
import math

import jax
import jax.numpy as jnp
from jax.experimental import pallas as pl
from jax.experimental.pallas import tpu as pltpu

_LANES = 128
_SUBLANES = 8


def _softplus(x):
    # Matches PyTorch nn.Softplus (beta=1, threshold=20): linear for x > 20,
    # log1p(exp(x)) otherwise (exp argument clamped for numerical safety).
    return jnp.where(x > 20.0, x, jnp.log1p(jnp.exp(jnp.minimum(x, 20.0))))


def _round_up(n, m):
    return ((n + m - 1) // m) * m


def dqn_kernel(x_ref, p_ref, o_ref, *, obs, r1):
    """x_ref: [Bp, 128]   p_ref: [r1 + 2*128 + 8, 128]   o_ref: [Bp, 128]."""
    x = x_ref[...]                              # [Bp, 128], lanes >= obs are zero
    w1 = p_ref[0:r1, :]                         # rows 0..obs-1 hold W1 (cols >= 20 zero)
    w2 = p_ref[r1:r1 + _LANES, :]               # [128,128]; rows >= 20, cols >= 10 zero
    w3 = p_ref[r1 + _LANES:r1 + 2 * _LANES, :]  # [128,128]; rows >= 10, cols >= act zero
    b = p_ref[r1 + 2 * _LANES:r1 + 2 * _LANES + _SUBLANES, :]  # row0=b1, row1=b2, row2=b3

    # Layer 1: contraction over K = obs (tiny) as unrolled VPU FMAs (no MXU trip).
    h1 = b[0:1, :]
    for k in range(obs):                        # obs is a static Python int
        h1 = h1 + x[:, k:k + 1] * w1[k:k + 1, :]
    h1 = _softplus(h1)
    # Padded lanes of h1 hold softplus(0) = log(2); the zero rows of w2 cancel them.

    h2 = _softplus(jnp.dot(h1, w2, preferred_element_type=jnp.float32) + b[1:2, :])
    out = jnp.dot(h2, w3, preferred_element_type=jnp.float32) + b[2:3, :]
    o_ref[...] = out.astype(o_ref.dtype)        # lane-dense [Bp, 128] store


def pack_params(params, obs, act):
    """Pack all 6 weight/bias arrays into one lane-dense [R, 128] f32 slab (1 DMA)."""
    w1, b1, w2, b2, w3, b3 = params
    h1, h2 = w1.shape[1], w2.shape[1]           # 20, 10
    assert obs <= _LANES and h1 <= _LANES and h2 <= _LANES and act <= _LANES
    r1 = _round_up(max(obs, 1), _SUBLANES)      # rows reserved for W1 block
    rows = r1 + 2 * _LANES + _SUBLANES
    slab = jnp.zeros((rows, _LANES), jnp.float32)
    slab = slab.at[0:obs, 0:h1].set(w1)                                  # W1
    slab = slab.at[r1:r1 + h1, 0:h2].set(w2)                             # W2 (padded 128x128)
    slab = slab.at[r1 + _LANES:r1 + _LANES + h2, 0:act].set(w3)          # W3 (padded 128x128)
    slab = slab.at[r1 + 2 * _LANES, 0:h1].set(b1[0])                     # b1
    slab = slab.at[r1 + 2 * _LANES + 1, 0:h2].set(b2[0])                 # b2
    slab = slab.at[r1 + 2 * _LANES + 2, 0:act].set(b3[0])                # b3
    return slab, r1


def dqn_forward(x, packed, *, obs, act, r1):
    B = x.shape[0]
    Bp = _round_up(B, _SUBLANES)
    # Layout plumbing only: lane-dense, zero-padded input tile.
    x_pad = jnp.zeros((Bp, _LANES), jnp.float32).at[:B, :obs].set(x)

    vmem = pl.BlockSpec(memory_space=pltpu.MemorySpace.VMEM)
    out_pad = pl.pallas_call(
        functools.partial(dqn_kernel, obs=obs, r1=r1),
        out_shape=jax.ShapeDtypeStruct((Bp, _LANES), jnp.float32),
        in_specs=[vmem, vmem],
        out_specs=vmem,
    )(x_pad, packed)
    return out_pad[:B, :act]


def init_params(key, obshape, actspace):
    # Deterministic init mimicking PyTorch nn.Linear default:
    # U(-1/sqrt(fan_in), 1/sqrt(fan_in)) for both weight and bias.
    # Weights stored as [in_features, out_features] so y = x @ W + b.
    dims = [(obshape, 20), (20, 10), (10, actspace)]
    params = []
    for (fan_in, fan_out) in dims:
        key, kw, kb = jax.random.split(key, 3)
        bound = 1.0 / math.sqrt(fan_in)
        w = jax.random.uniform(kw, (fan_in, fan_out), jnp.float32, -bound, bound)
        b = jax.random.uniform(kb, (1, fan_out), jnp.float32, -bound, bound)
        params += [w, b]
    return tuple(params)


def reference_forward(x, params):
    w1, b1, w2, b2, w3, b3 = params
    h1 = _softplus(x @ w1 + b1)
    h2 = _softplus(h1 @ w2 + b2)
    return h2 @ w3 + b3


if __name__ == "__main__":
    key = jax.random.PRNGKey(0)
    obshape, actspace, batch = 3, 5, 8          # Pendulum obs dim = 3
    kx, kp = jax.random.split(key)
    x = jax.random.normal(kx, (batch, obshape), jnp.float32)
    params = init_params(kp, obshape, actspace)
    packed, r1 = pack_params(params, obshape, actspace)

    out = dqn_forward(x, packed, obs=obshape, act=actspace, r1=r1)
    jax.block_until_ready(out)

    ref = reference_forward(x, params)
    assert out.shape == (batch, actspace)
    assert jnp.allclose(out, ref, atol=1e-5, rtol=1e-5)

    print("KERNEL_OK")
</pallas_src>

<mosaic_0001>
module attributes {stable_mosaic.version = 11 : i64} {
  func.func @dqn_kernel(%arg0: memref<8x128xf32, #tpu.memory_space<vmem>>, %arg1: memref<272x128xf32, #tpu.memory_space<vmem>>, %arg2: memref<8x128xf32, #tpu.memory_space<vmem>>) attributes {dimension_semantics = [], scalar_prefetch = 0 : i64, scratch_operands = 0 : i64, tpu.core_type = #tpu.core_type<tc>} {
    %c0 = arith.constant 0 : index
    %c0_0 = arith.constant 0 : index
    %0 = vector.load %arg0[%c0, %c0_0] : memref<8x128xf32, #tpu.memory_space<vmem>>, vector<8x128xf32>
    %c0_1 = arith.constant 0 : index
    %c0_2 = arith.constant 0 : index
    %1 = vector.load %arg1[%c0_1, %c0_2] : memref<272x128xf32, #tpu.memory_space<vmem>>, vector<8x128xf32>
    %c8 = arith.constant 8 : index
    %c0_3 = arith.constant 0 : index
    %2 = vector.load %arg1[%c8, %c0_3] : memref<272x128xf32, #tpu.memory_space<vmem>>, vector<128x128xf32>
    %c136 = arith.constant 136 : index
    %c0_4 = arith.constant 0 : index
    %3 = vector.load %arg1[%c136, %c0_4] : memref<272x128xf32, #tpu.memory_space<vmem>>, vector<128x128xf32>
    %c264 = arith.constant 264 : index
    %c0_5 = arith.constant 0 : index
    %4 = vector.load %arg1[%c264, %c0_5] : memref<272x128xf32, #tpu.memory_space<vmem>>, vector<8x128xf32>
    %5 = vector.extract_strided_slice %4 {offsets = [0, 0], sizes = [1, 128], strides = [1, 1]} : vector<8x128xf32> to vector<1x128xf32>
    %6 = vector.extract_strided_slice %0 {offsets = [0, 0], sizes = [8, 1], strides = [1, 1]} : vector<8x128xf32> to vector<8x1xf32>
    %7 = vector.extract_strided_slice %1 {offsets = [0, 0], sizes = [1, 128], strides = [1, 1]} : vector<8x128xf32> to vector<1x128xf32>
    %8 = vector.broadcast %6 : vector<8x1xf32> to vector<8x128xf32>
    %9 = vector.broadcast %7 : vector<1x128xf32> to vector<8x128xf32>
    %10 = arith.mulf %8, %9 : vector<8x128xf32>
    %11 = vector.broadcast %5 : vector<1x128xf32> to vector<8x128xf32>
    %12 = arith.addf %11, %10 : vector<8x128xf32>
    %13 = vector.extract_strided_slice %0 {offsets = [0, 1], sizes = [8, 1], strides = [1, 1]} : vector<8x128xf32> to vector<8x1xf32>
    %14 = vector.extract_strided_slice %1 {offsets = [1, 0], sizes = [1, 128], strides = [1, 1]} : vector<8x128xf32> to vector<1x128xf32>
    %15 = vector.broadcast %13 : vector<8x1xf32> to vector<8x128xf32>
    %16 = vector.broadcast %14 : vector<1x128xf32> to vector<8x128xf32>
    %17 = arith.mulf %15, %16 : vector<8x128xf32>
    %18 = arith.addf %12, %17 : vector<8x128xf32>
    %19 = vector.extract_strided_slice %0 {offsets = [0, 2], sizes = [8, 1], strides = [1, 1]} : vector<8x128xf32> to vector<8x1xf32>
    %20 = vector.extract_strided_slice %1 {offsets = [2, 0], sizes = [1, 128], strides = [1, 1]} : vector<8x128xf32> to vector<1x128xf32>
    %21 = vector.broadcast %19 : vector<8x1xf32> to vector<8x128xf32>
    %22 = vector.broadcast %20 : vector<1x128xf32> to vector<8x128xf32>
    %23 = arith.mulf %21, %22 : vector<8x128xf32>
    %24 = arith.addf %18, %23 : vector<8x128xf32>
    %cst = arith.constant 2.000000e+01 : f32
    %25 = vector.broadcast %cst : f32 to vector<8x128xf32>
    %26 = arith.cmpf ogt, %24, %25 : vector<8x128xf32>
    %cst_6 = arith.constant 2.000000e+01 : f32
    %27 = vector.broadcast %cst_6 : f32 to vector<8x128xf32>
    %28 = arith.minimumf %24, %27 : vector<8x128xf32>
    %29 = math.exp %28 : vector<8x128xf32>
    %30 = math.log1p %29 : vector<8x128xf32>
    %31 = arith.select %26, %24, %30 : vector<8x128xi1>, vector<8x128xf32>
    %cst_7 = arith.constant dense<0.000000e+00> : vector<8x128xf32>
    %32 = tpu.matmul %31, %2, %cst_7 {dimension_numbers = #tpu.dot_dimension_numbers<[1], [0], [0], [1], [0, 0, 1, 1], [], []>} : vector<8x128xf32>, vector<128x128xf32>, vector<8x128xf32> -> vector<8x128xf32>
    %33 = vector.extract_strided_slice %4 {offsets = [1, 0], sizes = [1, 128], strides = [1, 1]} : vector<8x128xf32> to vector<1x128xf32>
    %34 = vector.broadcast %33 : vector<1x128xf32> to vector<8x128xf32>
    %35 = arith.addf %32, %34 : vector<8x128xf32>
    %cst_8 = arith.constant 2.000000e+01 : f32
    %36 = vector.broadcast %cst_8 : f32 to vector<8x128xf32>
    %37 = arith.cmpf ogt, %35, %36 : vector<8x128xf32>
    %cst_9 = arith.constant 2.000000e+01 : f32
    %38 = vector.broadcast %cst_9 : f32 to vector<8x128xf32>
    %39 = arith.minimumf %35, %38 : vector<8x128xf32>
    %40 = math.exp %39 : vector<8x128xf32>
    %41 = math.log1p %40 : vector<8x128xf32>
    %42 = arith.select %37, %35, %41 : vector<8x128xi1>, vector<8x128xf32>
    %cst_10 = arith.constant dense<0.000000e+00> : vector<8x128xf32>
    %43 = tpu.matmul %42, %3, %cst_10 {dimension_numbers = #tpu.dot_dimension_numbers<[1], [0], [0], [1], [0, 0, 1, 1], [], []>} : vector<8x128xf32>, vector<128x128xf32>, vector<8x128xf32> -> vector<8x128xf32>
    %44 = vector.extract_strided_slice %4 {offsets = [2, 0], sizes = [1, 128], strides = [1, 1]} : vector<8x128xf32> to vector<1x128xf32>
    %45 = vector.broadcast %44 : vector<1x128xf32> to vector<8x128xf32>
    %46 = arith.addf %43, %45 : vector<8x128xf32>
    %c0_11 = arith.constant 0 : index
    %c0_12 = arith.constant 0 : index
    %47 = vector.load %arg2[%c0_11, %c0_12] : memref<8x128xf32, #tpu.memory_space<vmem>>, vector<8x128xf32>
    tpu.vector_store %arg2[%c0_11, %c0_12], %46 {strides = array<i32>} : memref<8x128xf32, #tpu.memory_space<vmem>>, vector<8x128xf32>,
    return
  }
}

</mosaic_0001>

<bundles_post_ra>
// kernel: tpu_custom_call.1
= control target key start
LH: loop header
LB: loop body
LE: loop exit
PB: predicated region body
PF: predicated region fallthrough
CT: control target
= control target key end

     0   :  { %7 = vsyncpa [#allocation3], 0  ;;  %s324_s0 = inlined_call_operand.hbm [shape: f32[8,128], index: 0, kind: input, shape index: {}]   ;;  %s325_s1 = inlined_call_operand.hbm [shape: f32[272,128], index: 1, kind: input, shape index: {}]   ;;  %s326_s2 = inlined_call_operand.hbm [shape: f32[8,128], index: 2, kind: output, shape index: {}]  }
   0x1   :  { %8 = vsyncpa [#allocation6], 0 }
   0x2   :  { %9 = vsyncpa [#allocation4], 0  ;;  %s15_s11 = sshll.u32 %s324_s0, 4  ;;  %s287_s12 = smov [#allocation2]   ;;  %s16_s11 = int_to_ptr.hbm [resolvable:$true] %s15_s11 }
   0x3   :  { %s17_s13 = sshll.u32 %s287_s12, 4  ;;  %s25_s16 = sshll.u32 %s325_s1, 4  ;;  %s18_s13 = int_to_ptr.vmem [resolvable:$true] %s17_s13  ;;  %s26_s16 = int_to_ptr.hbm [resolvable:$true] %s25_s16 }
   0x4   :  { %20 = dma.hbm_to_vmem [thread:$0]  %s16_s11, 128, %s18_s13, [#allocation3]  }
   0x5   :  { %s288_s17 = smov [#allocation5]   ;;  %s289_s19 = smov 128  }
   0x6   :  { %s27_s18 = sshll.u32 %s288_s17, 4  ;;  %s290_s20 = smov 8   ;;  %s28_s18 = int_to_ptr.vmem [resolvable:$true] %s27_s18 }
   0x7   :  { %33 = dma.hbm_to_vmem [thread:$0]  %s26_s16, 4352, %s28_s18, [#allocation6], %s289_s19, %s289_s19, %s290_s20  }
   0x8   :  { %281 = dma.done.wait [#allocation3], 128  }
   0x9   :  { %282 = vsyncadd [#allocation3], 4294967168 }
   0xa   :  { %283 = dma.done.wait [#allocation6], 4352  }
   0xb   :  { %284 = vsyncadd [#allocation6], 4294962944  ;;  %v291_v0 = vmov 0   ;;  %v292_v1 = vmov 2   ;;  %v42_v2 = vld [vmem:[#allocation2] sm:$0xff]  ;;  %v293_v3 = vmov 1  }
   0xc   :  { %197 = vset.pattern.permute.xlu0 %v291_v0  ;;  %199 = vset.pattern.permute.xlu1 %v292_v1  ;;  %v59_v4 = vld [vmem:[#allocation5 + $0x80] sm:$0xff]  ;;  %v58_v5 = vld [vmem:[#allocation5 + $0x78] sm:$0xff]  ;;  %v57_v6 = vld [vmem:[#allocation5 + $0x70] sm:$0xff]  ;;  %s294_s0 = smov [#allocation7]   ;;  %s178_s23 = sshll.u32 %s326_s2, 4  ;;  %s179_s23 = int_to_ptr.hbm [resolvable:$true] %s178_s23 }
   0xd   :  { %79 = vperm.xlu0 %197, %v42_v2   ;;  %94 = vperm.xlu1 %199, %v42_v2   ;;  %v56_v7 = vld [vmem:[#allocation5 + $0x68] sm:$0xff]  ;;  %v55_v8 = vld [vmem:[#allocation5 + $0x60] sm:$0xff]  ;;  %v54_v9 = vld [vmem:[#allocation5 + $0x58] sm:$0xff]  ;;  %s176_s1 = sshll.u32 %s294_s0, 4  ;;  %s177_s1 = int_to_ptr.vmem [resolvable:$true] %s176_s1 }
   0xe   :  { %115 = vmatpush.msra.mxu0 %v59_v4  ;;  %v53_v10 = vld [vmem:[#allocation5 + $0x50] sm:$0xff]  ;;  %v52_v11 = vld [vmem:[#allocation5 + $0x48] sm:$0xff]  ;;  %v51_v12 = vld [vmem:[#allocation5 + $0x40] sm:$0xff] }
   0xf   :  { %v50_v13 = vld [vmem:[#allocation5 + $0x38] sm:$0xff]  ;;  %v49_v14 = vld [vmem:[#allocation5 + $0x30] sm:$0xff]  ;;  %v48_v15 = vld [vmem:[#allocation5 + $0x28] sm:$0xff] }
  0x10   :  { %116 = vmatpush.msra.mxu0 %v58_v5  ;;  %v47_v16 = vld [vmem:[#allocation5 + $0x20] sm:$0xff]  ;;  %v46_v19 = vld [vmem:[#allocation5 + $0x18] sm:$0xff]  ;;  %v45_v21 = vld [vmem:[#allocation5 + $0x10] sm:$0xff] }
  0x11   :  { %v43_v17 = vld [vmem:[#allocation5] sm:$0xff]  ;;  %v316_v22 = vld [vmem:[#allocation5 + $0x108] sm:$0xff]  ;;  %v74_v30 = vld [vmem:[#allocation5 + $0xf8] sm:$0xff] }
  0x12   :  { %117 = vmatpush.msra.mxu0 %v57_v6  ;;  %v82_v20 = vperm.slane %v43_v17, 0  ;;  %v44_v23 = vld [vmem:[#allocation5 + $0x8] sm:$0xff]  ;;  %v84_v24 = vperm.slane %v316_v22, 0  ;;  %v90_v26 = vperm.slane %v43_v17, 1  ;;  %v97_v27 = vperm.slane %v43_v17, 2  ;;  %v75_v29 = vld [vmem:[#allocation5 + $0x100] sm:$0xff] }
  0x13   :  { %150 = vmatpush.msra.mxu1 %v75_v29  ;;  %v73_v49 = vld [vmem:[#allocation5 + $0xf0] sm:$0xff]  ;;  %v72_v50 = vld [vmem:[#allocation5 + $0xe8] sm:$0xff]  ;;  %v71_v51 = vld [vmem:[#allocation5 + $0xe0] sm:$0xff]  ;;  %v114_v63 = vperm.slane %v316_v22, 1 }
  0x14   :  { %118 = vmatpush.msra.mxu0 %v56_v7  ;;  %v70_v52 = vld [vmem:[#allocation5 + $0xd8] sm:$0xff]  ;;  %v69_v53 = vld [vmem:[#allocation5 + $0xd0] sm:$0xff]  ;;  %v68_v54 = vld [vmem:[#allocation5 + $0xc8] sm:$0xff] }
  0x15   :  { %198 = vset.pattern.permute.xlu0 %v293_v3  ;;  %151 = vmatpush.msra.mxu1 %v74_v30  ;;  %v67_v55 = vld [vmem:[#allocation5 + $0xc0] sm:$0xff]  ;;  %v66_v56 = vld [vmem:[#allocation5 + $0xb8] sm:$0xff]  ;;  %v65_v57 = vld [vmem:[#allocation5 + $0xb0] sm:$0xff] }
  0x16   :  { %87 = vperm.xlu0 %198, %v42_v2   ;;  %119 = vmatpush.msra.mxu0 %v55_v8  ;;  %v64_v58 = vld [vmem:[#allocation5 + $0xa8] sm:$0xff]  ;;  %v63_v59 = vld [vmem:[#allocation5 + $0xa0] sm:$0xff]  ;;  %v62_v60 = vld [vmem:[#allocation5 + $0x98] sm:$0xff] }
  0x17   :  { %152 = vmatpush.msra.mxu1 %v73_v49  ;;  %v61_v61 = vld [vmem:[#allocation5 + $0x90] sm:$0xff]  ;;  %v60_v62 = vld [vmem:[#allocation5 + $0x88] sm:$0xff] }
  0x18   :  { %120 = vmatpush.msra.mxu0 %v54_v9 }
  0x19   :  { %153 = vmatpush.msra.mxu1 %v72_v50 }
  0x1a   :  { %121 = vmatpush.msra.mxu0 %v53_v10 }
  0x1b   :  { %154 = vmatpush.msra.mxu1 %v71_v51 }
  0x1c   :  { %122 = vmatpush.msra.mxu0 %v52_v11 }
  0x1d   :  { %155 = vmatpush.msra.mxu1 %v70_v52 }
  0x1e   :  { %200 = vset.pattern.permute.xlu0 %v292_v1  ;;  %123 = vmatpush.msra.mxu0 %v51_v12 }
  0x1f   :  { %156 = vmatpush.msra.mxu1 %v69_v53 }
  0x20   :  { %124 = vmatpush.msra.mxu0 %v50_v13 }
  0x21   :  { %157 = vmatpush.msra.mxu1 %v68_v54 }
  0x22   :  { %125 = vmatpush.msra.mxu0 %v49_v14  ;;  %v149_v14 = vperm.slane %v316_v22, 2 }
  0x23   :  { %158 = vmatpush.msra.mxu1 %v67_v55 }
  0x24   :  { %126 = vmatpush.msra.mxu0 %v48_v15 }
  0x25   :  { %159 = vmatpush.msra.mxu1 %v66_v56 }
  0x26   :  { %127 = vmatpush.msra.mxu0 %v47_v16 }
  0x27   :  { %160 = vmatpush.msra.mxu1 %v65_v57 }
  0x28   :  { %128 = vmatpush.msra.mxu0 %v46_v19 }
  0x29   :  { %161 = vmatpush.msra.mxu1 %v64_v58 }
  0x2a   :  { %129 = vmatpush.msra.mxu0 %v45_v21 }
  0x2b   :  { %162 = vmatpush.msra.mxu1 %v63_v59 }
  0x2c   :  { %130 = vmatpush.msra.mxu0 %v44_v23 }
  0x2d   :  { %163 = vmatpush.msra.mxu1 %v62_v60 }
  0x2f   :  { %164 = vmatpush.msra.mxu1 %v61_v61 }
  0x31   :  { %165 = vmatpush.msra.mxu1 %v60_v62 }
  0x7f   :  { %v80_v18 = vpop.permute.xlu0 %79  ;;  %v95_v28 = vpop.permute.xlu1 %94 }
  0x80   :  { %v83_v25 = vmul.f32 %v82_v20, %v80_v18  ;;  %v98_v34 = vmul.f32 %v97_v27, %v95_v28 }
  0x82   :  { %v85_v32 = vadd.f32 %v84_v24, %v83_v25 }
  0x88   :  { %v88_v31 = vpop.permute.xlu0 %87 }
  0x89   :  { %v91_v33 = vmul.f32 %v90_v26, %v88_v31 }
  0x8b   :  { %v92_v35 = vadd.f32 %v91_v33, %v85_v32 }
  0x8d   :  { %v99_v36 = vadd.f32 %v98_v34, %v92_v35 }
  0x8f   :  { %v101_v37 = vmin.f32 %v99_v36, 20.0  ;;  %vm100_vm1 = vcmp.gt.f32.partialorder %v99_v36, 20.0 }
  0x91   :  { %v102_v38 = vmul.f32 1.442695, %v101_v37 }
  0x93   :  { %201 = vpow2.f32 %v102_v38 }
  0x99   :  { %v202_v39 = vpop.eup %201 }
  0x9a   :  { %v104_v40 = vadd.f32 1.0, %v202_v39  ;;  %v107_v41 = vmul.f32 -0.5, %v202_v39  ;;  %v110_v43 = vand.u32 2147483647, %v202_v39 }
  0x9c   :  { %203 = vlog2.f32 %v104_v40  ;;  %v108_v42 = vadd.f32 1.0, %v107_v41  ;;  %vm111_vm0 = vcmp.lt.f32.partialorder %v110_v43, 0.0004427343 }
  0x9e   :  { %v109_v46 = vmul.f32 %v202_v39, %v108_v42 }
  0xa2   :  { %v204_v44 = vpop.eup %203 }
  0xa3   :  { %v106_v45 = vmul.f32 0.6931472, %v204_v44 }
  0xa5   :  { %v112_v47 = vsel %vm111_vm0, %v109_v46, %v106_v45 }
  0xa6   :  { %v113_v48 = vsel %vm100_vm1, %v99_v36, %v112_v47 }
  0xa7   :  { %131 = vmatmul.f32.vlgmr.msra.gmra.mxu0 %v113_v48 }
 0x124   :  { %v132_v0 = vpop.f32.mrf.mxu0 }
 0x125   :  { %v133_v1 = vadd.f32 %v132_v0, %v114_v63 }
 0x127   :  { %v136_v2 = vmin.f32 %v133_v1, 20.0  ;;  %vm135_vm3 = vcmp.gt.f32.partialorder %v133_v1, 20.0 }
 0x129   :  { %v137_v3 = vmul.f32 1.442695, %v136_v2 }
 0x12b   :  { %205 = vpow2.f32 %v137_v3 }
 0x131   :  { %v206_v4 = vpop.eup %205 }
 0x132   :  { %v139_v5 = vadd.f32 1.0, %v206_v4  ;;  %v142_v6 = vmul.f32 -0.5, %v206_v4  ;;  %v145_v8 = vand.u32 2147483647, %v206_v4 }
 0x134   :  { %207 = vlog2.f32 %v139_v5  ;;  %v143_v7 = vadd.f32 1.0, %v142_v6  ;;  %vm146_vm2 = vcmp.lt.f32.partialorder %v145_v8, 0.0004427343 }
 0x136   :  { %v144_v11 = vmul.f32 %v206_v4, %v143_v7 }
 0x13a   :  { %v208_v9 = vpop.eup %207 }
 0x13b   :  { %v141_v10 = vmul.f32 0.6931472, %v208_v9 }
 0x13d   :  { %v147_v12 = vsel %vm146_vm2, %v144_v11, %v141_v10 }
 0x13e   :  { %v148_v13 = vsel %vm135_vm3, %v133_v1, %v147_v12 }
 0x13f   :  { %166 = vmatmul.f32.vlgmr.msra.gmra.mxu1 %v148_v13 }
 0x1bc   :  { %v167_v15 = vpop.f32.mrf.mxu1 }
 0x1bd   :  { %v168_v16 = vadd.f32 %v167_v15, %v149_v14 }
 0x1bf   :  { %170 = vst [vmem:[#allocation7] sm:$0xff] %v168_v16 }
 0x1c0   :  { %181 = dma.vmem_to_hbm [thread:$0]  %s177_s1, 128, %s179_s23, [#allocation4]  }
 0x1c1   :  { %285 = dma.done.wait [#allocation4], 128  }
 0x1c2   :  { %286 = vsyncadd [#allocation4], 4294967168 }
 0x1c3   :  { %186 = vsyncpa [#allocation3], 1 }
 0x1c4   :  { %187 = vsyncpa [#allocation6], 1 }
 0x1c5   :  { %188 = vsyncpa [#allocation4], 1 }

</bundles_post_ra>
